<compile_context>
chip_gen: v6e
topology: v6e:2x2x1
jax: 0.10.0
libtpu: 0.0.40
codegen_flags: <defaults>
</compile_context>

<pallas_src>
import jax
import jax.numpy as jnp
from jax.experimental import pallas as pl
from jax.experimental.pallas import tpu as pltpu

_MiB = 1024 * 1024


def _drop_path_kernel(x_ref, mask_ref, o_ref):
    # x_ref:    (tile_t, tile_bc) tile of the flattened (T, B*C) input.
    # mask_ref: (1, tile_bc) pre-scaled per-sample mask (broadcast over rows).
    o_ref[...] = x_ref[...] * mask_ref[...]


def _chip_tuning():
    """Generation-aware (block_byte_target, vmem_limit_bytes)."""
    target = 4 * _MiB          # v5e / v6e: ~85%+ of HBM roofline at 2-4 MiB.
    vmem_limit = 48 * _MiB
    try:
        info = pltpu.get_tpu_info()
        vmem = getattr(info, "vmem_capacity_bytes", None)
        if vmem is not None and vmem <= 64 * _MiB:
            # v7x-class: 3.2 TB/s HBM -> grow blocks to 8 MiB to amortize the
            # fixed per-step cost; 4x tile double-buffering (32 MiB) + mask
            # still fits well under the 64 MiB physical VMEM.
            target = 8 * _MiB
            vmem_limit = 48 * _MiB
    except Exception:
        pass  # fall back to conservative defaults
    return target, vmem_limit


def _choose_tiles(T, BC, itemsize, target_bytes):
    """Pick (tile_t, tile_bc) ~ target_bytes, lane-dense and sublane-aligned."""
    # Lane (BC) axis: keep the whole row if 8 sublanes of it fit the budget,
    # otherwise tile in multiples of 128 so stores stay unmasked vst.
    if 8 * BC * itemsize <= target_bytes or BC <= 128:
        tile_bc = BC
    else:
        tile_bc = int(max(128, (target_bytes // (8 * itemsize) // 128) * 128))

    # Sublane (T) axis: fill up to the target with multiples of 8 (or full T).
    tile_t_cap = max(1, target_bytes // max(tile_bc * itemsize, 1))
    if tile_t_cap >= T:
        tile_t = T
    else:
        tile_t = min(int(max(8, (tile_t_cap // 8) * 8)), T)

    # Megacore (v7x has 2 TCs): make sure the 'parallel' grid has >= 2 steps
    # to shard whenever the problem is big enough.
    if pl.cdiv(T, tile_t) * pl.cdiv(BC, tile_bc) < 2 and T > 8:
        tile_t = min(int(max(8, ((pl.cdiv(T, 2) + 7) // 8) * 8)), T)
    return tile_t, tile_bc


def drop_path_pallas(x, drop_prob: float, key, training: bool = True,
                     *, donate_x: bool = False,
                     small_bytes: int = 256 * 1024):
    """Pallas implementation of DropPath.forward for x of shape (T, B, C)."""
    if drop_prob == 0.0 or not training:
        return x
    keep_prob = 1.0 - drop_prob
    T, B, C = x.shape
    BC = B * C
    itemsize = x.dtype.itemsize

    # random_tensor = floor(keep_prob + U[0,1)) in {0,1}, one per batch
    # element, computed in f32 and pre-scaled by 1/keep_prob.
    rand = jax.random.uniform(key, (B,), dtype=jnp.float32)
    mask = jnp.floor(keep_prob + rand) * (1.0 / keep_prob)            # (B,)

    # Small-problem fast path: fixed pallas_call + grid-step overhead
    # dominates tiny activations; XLA fuses this multiply for free.
    if T * BC * itemsize < small_bytes:
        return x * mask[None, :, None].astype(x.dtype)

    mask_flat = jnp.broadcast_to(mask[None, :, None], (1, B, C))
    mask_flat = mask_flat.reshape(1, BC).astype(x.dtype)              # (1, BC)
    x_flat = x.reshape(T, BC)  # pure minor-dim merge; lane-dense last dim
    # NOTE: if BC is not a multiple of 128 the kernel is still correct (masked
    # vst on the lane tail); typical transformer widths are already lane-dense.

    target_bytes, vmem_limit = _chip_tuning()
    tile_t, tile_bc = _choose_tiles(T, BC, itemsize, target_bytes)
    grid = (pl.cdiv(T, tile_t), pl.cdiv(BC, tile_bc))

    # Ensure the scoped-VMEM limit covers double-buffered in+out + mask.
    tile_bytes = tile_t * tile_bc * itemsize
    vmem_limit = int(max(vmem_limit,
                         4 * tile_bytes + 4 * tile_bc * itemsize + 2 * _MiB))

    cost = pl.CostEstimate(
        flops=T * BC,
        transcendentals=0,
        bytes_accessed=2 * T * BC * itemsize + BC * itemsize,
    )

    out_flat = pl.pallas_call(
        _drop_path_kernel,
        out_shape=jax.ShapeDtypeStruct((T, BC), x.dtype),
        grid=grid,
        in_specs=[
            pl.BlockSpec((tile_t, tile_bc), lambda t, c: (t, c)),   # x tile
            pl.BlockSpec((1, tile_bc), lambda t, c: (0, c)),        # mask row
        ],
        out_specs=pl.BlockSpec((tile_t, tile_bc), lambda t, c: (t, c)),
        compiler_params=pltpu.CompilerParams(
            dimension_semantics=("parallel", "parallel"),
            vmem_limit_bytes=vmem_limit,
        ),
        cost_estimate=cost,
        # Pure in-place scale: aliasing x halves peak HBM footprint when the
        # caller donates x (opt-in so non-donated callers keep their buffer).
        input_output_aliases=({0: 0} if donate_x else {}),
    )(x_flat, mask_flat)

    return out_flat.reshape(T, B, C)


if __name__ == "__main__":
    key = jax.random.PRNGKey(0)
    k_x, k_mask = jax.random.split(key)
    drop_prob = 0.3
    keep_prob = 1.0 - drop_prob

    # Fairseq-style (T, B, C); B*C = 1024 (lane-dense) and 512 KiB total so
    # the Pallas path (not the tiny-activation fast path) is exercised.
    T, B, C = 128, 8, 128
    x = jax.random.normal(k_x, (T, B, C), dtype=jnp.float32)

    out = drop_path_pallas(x, drop_prob, k_mask, training=True)
    out = jax.block_until_ready(out)

    # Reference (pure JAX) check of the same semantics.
    rand = jax.random.uniform(k_mask, (B,), dtype=jnp.float32)
    ref_mask = jnp.floor(keep_prob + rand)
    ref = x / keep_prob * ref_mask[None, :, None].astype(x.dtype)
    assert out.shape == x.shape and out.dtype == x.dtype
    assert jnp.allclose(out, ref, atol=1e-5, rtol=1e-5)

    # Tiny-activation fast path (plain JAX) has identical semantics.
    Ts, Bs, Cs = 8, 2, 32
    xs = jax.random.normal(k_x, (Ts, Bs, Cs), dtype=jnp.float32)
    outs = jax.block_until_ready(drop_path_pallas(xs, drop_prob, k_mask))
    rands = jax.random.uniform(k_mask, (Bs,), dtype=jnp.float32)
    refs = xs / keep_prob * jnp.floor(keep_prob + rands)[None, :, None]
    assert jnp.allclose(outs, refs, atol=1e-5, rtol=1e-5)

    # Eval path and drop_prob=0 path are identity.
    assert jnp.array_equal(drop_path_pallas(x, drop_prob, k_mask, training=False), x)
    assert jnp.array_equal(drop_path_pallas(x, 0.0, k_mask, training=True), x)

    print("KERNEL_OK")
</pallas_src>

<mosaic_0001>
module attributes {stable_mosaic.version = 11 : i64} {
  func.func @_drop_path_kernel(%arg0: i32, %arg1: i32, %arg2: memref<64x1024xf32, #tpu.memory_space<vmem>>, %arg3: memref<1x1024xf32, #tpu.memory_space<vmem>>, %arg4: memref<64x1024xf32, #tpu.memory_space<vmem>>) attributes {dimension_semantics = [#tpu.dimension_semantics<parallel>, #tpu.dimension_semantics<parallel>], iteration_bounds = array<i64: 2, 1>, scalar_prefetch = 0 : i64, scratch_operands = 0 : i64, tpu.core_type = #tpu.core_type<tc>, window_params = [{transform_indices = @transform_0, window_bounds = array<i64: 64, 1024>}, {transform_indices = @transform_1, window_bounds = array<i64: 1, 1024>}, {transform_indices = @transform_2, window_bounds = array<i64: 64, 1024>}]} {
    %c0 = arith.constant 0 : index
    %c0_0 = arith.constant 0 : index
    %0 = vector.load %arg2[%c0, %c0_0] : memref<64x1024xf32, #tpu.memory_space<vmem>>, vector<64x1024xf32>
    %c0_1 = arith.constant 0 : index
    %c0_2 = arith.constant 0 : index
    %1 = vector.load %arg3[%c0_1, %c0_2] : memref<1x1024xf32, #tpu.memory_space<vmem>>, vector<1x1024xf32>
    %2 = vector.broadcast %1 : vector<1x1024xf32> to vector<64x1024xf32>
    %3 = arith.mulf %0, %2 : vector<64x1024xf32>
    %c0_3 = arith.constant 0 : index
    %c0_4 = arith.constant 0 : index
    %4 = vector.load %arg4[%c0_3, %c0_4] : memref<64x1024xf32, #tpu.memory_space<vmem>>, vector<64x1024xf32>
    tpu.vector_store %arg4[%c0_3, %c0_4], %3 {strides = array<i32>} : memref<64x1024xf32, #tpu.memory_space<vmem>>, vector<64x1024xf32>,
    return
  }
  func.func @transform_0(%arg0: i32, %arg1: i32) -> (i32, i32) {
    %c0_i32 = arith.constant 0 : i32
    return %arg0, %arg1 : i32, i32
  }
  func.func @transform_1(%arg0: i32, %arg1: i32) -> (i32, i32) {
    %c0_i32 = arith.constant 0 : i32
    %c0_i32_0 = arith.constant 0 : i32
    return %c0_i32, %arg1 : i32, i32
  }
  func.func @transform_2(%arg0: i32, %arg1: i32) -> (i32, i32) {
    %c0_i32 = arith.constant 0 : i32
    return %arg0, %arg1 : i32, i32
  }
}

</mosaic_0001>

<bundles_post_ra>
// kernel: tpu_custom_call.1
= control target key start
LH: loop header
LB: loop body
LE: loop exit
PB: predicated region body
PF: predicated region fallthrough
CT: control target
= control target key end

     0   :  { %7 = vsyncpa [#allocation3], 0  ;;  %s1213_s0 = inlined_call_operand.hbm [shape: f32[128,1024], index: 0, kind: input, shape index: {}]   ;;  %s1214_s1 = inlined_call_operand.hbm [shape: f32[1,1024], index: 1, kind: input, shape index: {}]   ;;  %s1215_s2 = inlined_call_operand.hbm [shape: f32[128,1024], index: 2, kind: output, shape index: {}]  }
   0x1   :  { %9 = vsyncpa [#allocation3 + $0x1], 0 }
   0x2   :  { %10 = vsyncpa [#allocation6], 0 }
   0x3   :  { %11 = vsyncpa [#allocation4], 0 }
   0x4   :  { %13 = vsyncpa [#allocation4 + $0x1], 0  ;;  %s819_s9 = smov 0   ;;  %s821_s10 = smov 0  }
   0x5   :  { %s823_s11 = smov 0   ;;  %s825_s12 = smov 0  }
   0x6   :  { %s827_s13 = smov 0   ;;  %s829_s14 = smov 0  }
   0x7 LB: > { %s557_s15 = sadd.s32 4294967295, %s795_s14   ;;  %s558_s16 = sadd.s32 4294967294, %s795_s14   ;;  %s795_s14 = sphi %s829_s14, %s19_s14   ;;  %s791_s13 = sphi %s827_s13, %s1234_s13   ;;  %s787_s12 = sphi %s825_s12, %s1233_s12   ;;  %s783_s11 = sphi %s823_s11, %s1232_s11   ;;  %s779_s10 = sphi %s821_s10, %s1231_s10   ;;  %s775_s9 = sphi %s819_s9, %s1230_s9  }
   0x8   : > { %s40_s17 = sadd.s32 1, %s783_s11  ;;  %p47_p0 = scmp.ne.s32.totalorder %s783_s11, %s779_s10 }
   0x9   : > { %p48_p1 = scmp.eq.s32.totalorder %s795_s14, 0  ;;  %p53_p2 = scmp.ne.s32.totalorder %s779_s10, %s775_s9 }
   0xa   : > { %p857_p3 = scmp.eq.s32.totalorder %s557_s15, 0  ;;  %p105_p4 = scmp.eq.s32.totalorder %s557_s15, 1 }
   0xb   : > { %p861_p5 = por %p48_p1, %p47_p0  ;;  %p111_p6 = scmp.eq.s32.totalorder %s558_s16, 1 }
   0xc   : > { %p867_p7 = por %p857_p3, %p53_p2  ;;  %p871_p8 = por %p105_p4, %p47_p0 }
   0xd   : > { %p875_p9 = por %p111_p6, %p53_p2  ;;  %p559_p10 = scmp.ge.s32.totalorder %s795_s14, 1 }
   0xe   : > { %s1220_s20 = scalar_select %p867_p7, 1, 0 }
   0xf   : > { %s1221_s21 = scalar_select %p871_p8, 1, 0 }
  0x10   : > { %s1222_s22 = scalar_select %p875_p9, 1, 0 }
  0x11   : > { %p118_p11 = scmp.lt.s32.totalorder %s795_s14, 3  ;;  %s797_s24 = smov [#allocation5]  }
  0x12   : > { %s134_s25 = sshll.u32 %s797_s24, 4  ;;  %p601_p1 = scmp.lt.s32.totalorder %s795_s14, 2  ;;  %s135_s25 = int_to_ptr.vmem [resolvable:$true] %s134_s25 }
  0x13   : > { %p882_p13 = pnand %p559_p10, %p118_p11  ;;  %s31_s28 = sadd.s32 1, %s791_s13 }
  0x14   : > { %p891_p4 = pnand %p601_p1, %p861_p5  ;;  %p33_p6 = scmp.ge.s32.totalorder %s31_s28, 2 }
  0x15   : > { %p588_p0 = pneg %p882_p13  ;;  %s145_s29 = sand.u32 1, %s783_s11  }
  0x16   : > { %s668_s30 = scalar_lea.vmem %s135_s25, 128  ;;  %p676_p8 = scmp.lt.s32.totalorder %s135_s25, %s135_s25 }
  0x17   : > { %p897_p2 = pnand %p588_p0, %p857_p3  ;;  %p669_p11 = scmp.ne.s32.totalorder %s135_s25, %s668_s30 }
  0x18   : > { %p677_p5 = scmp.lt.s32.totalorder %s668_s30, %s668_s30 }
  0x19   : > { %p659_p10 = pneg %p897_p2 }
  0x1a   : > { %p678_p1 = por %p677_p5, %p676_p8 }
  0x1b   : > { %p671_p12 = pnand %p669_p11, %p659_p10 }
  0x1d   : > { %p672_p9 = pneg %p671_p12 }
  0x1f   : > { %p679_p7 = pnand %p678_p1, %p672_p9 }
  0x21   : > { %682 = shalt.err (!%p679_p7)
}
  0x22   : > { %591 = dma.hbm_to_vmem [thread:$0]  (!%p897_p2), %s1214_s1, 128, %s135_s25, [#allocation6]  }
  0x23   : > { %s1236_s28 = smov (%p33_p6, %s31_s28), 0  ;;  %s562_s5 = sshll.u32 %s145_s29, 9 }
  0x24   : > { %s35_s6 = ssub.s32 %s791_s13, %s1236_s28  ;;  %s577_s7 = sshll.u32 %s791_s13, 13 }
  0x25   : > { %p38_p12 = scmp.eq.s32.totalorder %s35_s6, 0  ;;  %s158_s16 = scalar_lea.hbm %s1213_s0, %s577_s7 }
  0x26   : > { %s149_s19 = scalar_lea.vmem [#allocation2], %s562_s5  ;;  %s146_s30 = scalar_lea.sflag [#allocation3], %s145_s29 }
  0x27   : > { %s159_s24 = sshll.u32 %s149_s19, 4  ;;  %p685_p7 = pneg %p891_p4  ;;  %s160_s24 = int_to_ptr.vmem [resolvable:$true] %s159_s24 }
  0x28   : > { %s921_s27 = scalar_select %p38_p12, %s783_s11, %s40_s17  }
  0x29   : > { %s696_s25 = scalar_lea.vmem %s160_s24, 8192  ;;  %s798_s3 = smov [#allocation2]  }
  0x2a   : > { %p697_p8 = scmp.ne.s32.totalorder %s160_s24, %s696_s25  ;;  %s701_s4 = sshll.u32 %s798_s3, 4  ;;  %s702_s4 = int_to_ptr.vmem [resolvable:$false] %s701_s4 }
  0x2b   : > { %s703_s6 = scalar_lea.vmem %s702_s4, 16384  ;;  %p704_p2 = scmp.lt.s32.totalorder %s160_s24, %s702_s4 }
  0x2c   : > { %p699_p9 = pnand %p697_p8, %p685_p7  ;;  %p705_p6 = scmp.lt.s32.totalorder %s703_s6, %s696_s25 }
  0x2e   : > { %p700_p0 = pneg %p699_p9  ;;  %p706_p10 = por %p705_p6, %p704_p2 }
  0x30   : > { %p707_p11 = pnand %p706_p10, %p700_p0 }
  0x32   : > { %710 = shalt.err (!%p707_p11)
}
  0x33   : > { %s799_s5 = smov 1024   ;;  %s800_s17 = smov 64  }
  0x34   : > { %595 = dma.hbm_to_vmem [thread:$0]  (!%p891_p4), %s158_s16, 8192, %s160_s24, %s146_s30, %s799_s5, %s799_s5, %s800_s17  }
  0x35   : > { %171 = sbr.rel (%p882_p13) target bundleno = 116 (0x74), region = 28  ;;  %s930_s29 = sand.u32 (!%p882_p13), 1, %s779_s10  }
  0x36   : > { %s567_s7 = sshll.u32 (!%p882_p13), %s930_s29, 9  ;;  %s174_s8 = scalar_lea.sflag (!%p882_p13), [#allocation3], %s930_s29 }
  0x37   : > { %s936_s15 = scalar_lea.vmem (!%p882_p13), [#allocation2], %s567_s7  ;;  %p1226_p5 = scmp.ne.s32.totalorder (!%p882_p13), %s1220_s20, 0 }
  0x3a   : > { %762 = dma.done.wait (%p1226_p5), %s174_s8, 8192  }
  0x3b   : > { %764 = vsyncadd (%p1226_p5), %s174_s8, 4294959104 }
  0x3c   : > { %766 = dma.done.wait (%p857_p3), [#allocation6], 128  }
  0x3d   : > { %768 = vsyncadd (%p857_p3), [#allocation6], 4294967168  ;;  %v273_v0 = vlaneseq  ;;  %v207_v10 = vld [vmem:[%s936_s15] sm:$0xff]  ;;  %v208_v12 = vld [vmem:[%s936_s15 + $0x8] sm:$0xff]  ;;  %s986_s18 = scalar_lea.vmem [#allocation7], %s567_s7  ;;  %s579_s20 = sshll.u32 %s787_s12, 13 }
  0x3e   : > { %v271_v11 = vld [vmem:[#allocation5] sm:$0xff]  ;;  %v209_v15 = vld [vmem:[%s936_s15 + $0x10] sm:$0xff]  ;;  %v210_v17 = vld [vmem:[%s936_s15 + $0x18] sm:$0xff]  ;;  %s458_s23 = sshll.u32 %s986_s18, 4  ;;  %s1153_s16 = scalar_lea.hbm %s1215_s2, %s579_s20  ;;  %s1155_s23 = int_to_ptr.vmem [resolvable:$true] %s458_s23 }
  0x3f   : > { %v274_v1 = vshrl.u32 %v273_v0, 7  ;;  %v211_v19 = vld [vmem:[%s936_s15 + $0x20] sm:$0xff]  ;;  %v212_v21 = vld [vmem:[%s936_s15 + $0x28] sm:$0xff]  ;;  %v213_v23 = vld [vmem:[%s936_s15 + $0x30] sm:$0xff]  ;;  %s442_s19 = scalar_lea.sflag [#allocation4], %s930_s29  ;;  %s711_s24 = scalar_lea.vmem %s1155_s23, 8192 }
  0x40   : > { %v214_v25 = vld [vmem:[%s936_s15 + $0x38] sm:$0xff]  ;;  %v215_v31 = vld [vmem:[%s936_s15 + $0x40] sm:$0xff]  ;;  %v216_v32 = vld [vmem:[%s936_s15 + $0x48] sm:$0xff]  ;;  %p712_p3 = scmp.ne.s32.totalorder %s1155_s23, %s711_s24  ;;  %p1227_p13 = scmp.ne.s32.totalorder %s1221_s21, 0 }
  0x41   : > { %v275_v2 = vsub.s32 0, %v274_v1  ;;  %v279_v3 = vsub.s32 1, %v274_v1  ;;  %v283_v4 = vsub.s32 2, %v274_v1  ;;  %v287_v5 = vsub.s32 3, %v274_v1  ;;  %v217_v33 = vld [vmem:[%s936_s15 + $0x50] sm:$0xff]  ;;  %v218_v38 = vld [vmem:[%s936_s15 + $0x58] sm:$0xff] }
  0x42   : > { %v291_v6 = vsub.s32 4, %v274_v1  ;;  %v295_v7 = vsub.s32 5, %v274_v1  ;;  %v299_v8 = vsub.s32 6, %v274_v1  ;;  %v303_v9 = vsub.s32 7, %v274_v1  ;;  %v219_v39 = vld [vmem:[%s936_s15 + $0x60] sm:$0xff]  ;;  %v220_v40 = vld [vmem:[%s936_s15 + $0x68] sm:$0xff]  ;;  %p713_p4 = pnand %p712_p3, %p1227_p13 }
  0x43   : > { %v948_v13 = vrot.slane %v271_v11, %v275_v2  ;;  %v950_v14 = vrot.slane %v271_v11, %v279_v3  ;;  %v953_v16 = vrot.slane %v271_v11, %v283_v4  ;;  %v956_v18 = vrot.slane %v271_v11, %v287_v5  ;;  %v221_v45 = vld [vmem:[%s936_s15 + $0x70] sm:$0xff]  ;;  %v222_v46 = vld [vmem:[%s936_s15 + $0x78] sm:$0xff]  ;;  %v223_v47 = vld [vmem:[%s936_s15 + $0x80] sm:$0xff]  ;;  %s801_s30 = smov [#allocation7]  }
  0x44   : > { %v959_v20 = vrot.slane %v271_v11, %v291_v6  ;;  %v962_v22 = vrot.slane %v271_v11, %v295_v7  ;;  %v965_v24 = vrot.slane %v271_v11, %v299_v8  ;;  %v968_v26 = vrot.slane %v271_v11, %v303_v9  ;;  %v224_v52 = vld [vmem:[%s936_s15 + $0x88] sm:$0xff]  ;;  %v225_v53 = vld [vmem:[%s936_s15 + $0x90] sm:$0xff]  ;;  %v226_v54 = vld [vmem:[%s936_s15 + $0x98] sm:$0xff]  ;;  %p714_p1 = pneg %p713_p4  ;;  %s715_s25 = sshll.u32 %s801_s30, 4  ;;  %s716_s25 = int_to_ptr.vmem [resolvable:$false] %s715_s25 }
  0x45   : > { %v313_v27 = vmul.f32 %v948_v13, %v207_v10  ;;  %v314_v28 = vmul.f32 %v950_v14, %v208_v12  ;;  %v315_v29 = vmul.f32 %v953_v16, %v209_v15  ;;  %v316_v30 = vmul.f32 %v956_v18, %v210_v17  ;;  %v227_v59 = vld [vmem:[%s936_s15 + $0xa0] sm:$0xff]  ;;  %v228_v60 = vld [vmem:[%s936_s15 + $0xa8] sm:$0xff]  ;;  %v229_v61 = vld [vmem:[%s936_s15 + $0xb0] sm:$0xff]  ;;  %s717_s3 = scalar_lea.vmem %s716_s25, 16384  ;;  %p718_p12 = scmp.lt.s32.totalorder %s1155_s23, %s716_s25 }
  0x46   : > { %v317_v34 = vmul.f32 %v959_v20, %v211_v19  ;;  %v318_v35 = vmul.f32 %v962_v22, %v212_v21  ;;  %v319_v36 = vmul.f32 %v965_v24, %v213_v23  ;;  %v320_v37 = vmul.f32 %v968_v26, %v214_v25  ;;  %v230_v1 = vld [vmem:[%s936_s15 + $0xb8] sm:$0xff]  ;;  %v231_v2 = vld [vmem:[%s936_s15 + $0xc0] sm:$0xff]  ;;  %v232_v3 = vld [vmem:[%s936_s15 + $0xc8] sm:$0xff]  ;;  %p719_p7 = scmp.lt.s32.totalorder %s717_s3, %s711_s24 }
  0x47   : > { %377 = vst [vmem:[%s986_s18] sm:$0xff] %v313_v27  ;;  %378 = vst [vmem:[%s986_s18 + $0x8] sm:$0xff] %v314_v28  ;;  %v321_v41 = vmul.f32 %v948_v13, %v215_v31  ;;  %v322_v42 = vmul.f32 %v950_v14, %v216_v32  ;;  %v323_v43 = vmul.f32 %v953_v16, %v217_v33  ;;  %v233_v7 = vld [vmem:[%s936_s15 + $0xd0] sm:$0xff]  ;;  %v234_v8 = vld [vmem:[%s936_s15 + $0xd8] sm:$0xff] }
  0x48   : > { %379 = vst [vmem:[%s986_s18 + $0x10] sm:$0xff] %v315_v29  ;;  %380 = vst [vmem:[%s986_s18 + $0x18] sm:$0xff] %v316_v30  ;;  %v324_v44 = vmul.f32 %v956_v18, %v218_v38  ;;  %v325_v48 = vmul.f32 %v959_v20, %v219_v39  ;;  %v326_v49 = vmul.f32 %v962_v22, %v220_v40  ;;  %v235_v9 = vld [vmem:[%s936_s15 + $0xe0] sm:$0xff]  ;;  %v236_v15 = vld [vmem:[%s936_s15 + $0xe8] sm:$0xff]  ;;  %p720_p8 = por %p719_p7, %p718_p12 }
  0x49   : > { %381 = vst [vmem:[%s986_s18 + $0x20] sm:$0xff] %v317_v34  ;;  %382 = vst [vmem:[%s986_s18 + $0x28] sm:$0xff] %v318_v35  ;;  %v327_v50 = vmul.f32 %v965_v24, %v221_v45  ;;  %v328_v51 = vmul.f32 %v968_v26, %v222_v46  ;;  %v329_v55 = vmul.f32 %v948_v13, %v223_v47  ;;  %v237_v17 = vld [vmem:[%s936_s15 + $0xf0] sm:$0xff]  ;;  %v238_v19 = vld [vmem:[%s936_s15 + $0xf8] sm:$0xff] }
  0x4a   : > { %383 = vst [vmem:[%s986_s18 + $0x30] sm:$0xff] %v319_v36  ;;  %384 = vst [vmem:[%s986_s18 + $0x38] sm:$0xff] %v320_v37  ;;  %v330_v56 = vmul.f32 %v950_v14, %v224_v52  ;;  %v331_v57 = vmul.f32 %v953_v16, %v225_v53  ;;  %v332_v58 = vmul.f32 %v956_v18, %v226_v54  ;;  %v239_v27 = vld [vmem:[%s936_s15 + $0x100] sm:$0xff]  ;;  %v240_v28 = vld [vmem:[%s936_s15 + $0x108] sm:$0xff]  ;;  %p721_p9 = pnand %p720_p8, %p714_p1 }
  0x4b   : > { %385 = vst [vmem:[%s986_s18 + $0x40] sm:$0xff] %v321_v41  ;;  %386 = vst [vmem:[%s986_s18 + $0x48] sm:$0xff] %v322_v42  ;;  %v333_v62 = vmul.f32 %v959_v20, %v227_v59  ;;  %v334_v63 = vmul.f32 %v962_v22, %v228_v60  ;;  %v335_v0 = vmul.f32 %v965_v24, %v229_v61  ;;  %v241_v29 = vld [vmem:[%s936_s15 + $0x110] sm:$0xff]  ;;  %v242_v33 = vld [vmem:[%s936_s15 + $0x118] sm:$0xff] }
  0x4c   : > { %387 = vst [vmem:[%s986_s18 + $0x50] sm:$0xff] %v323_v43  ;;  %388 = vst [vmem:[%s986_s18 + $0x58] sm:$0xff] %v324_v44  ;;  %v336_v4 = vmul.f32 %v968_v26, %v230_v1  ;;  %v337_v5 = vmul.f32 %v948_v13, %v231_v2  ;;  %v338_v6 = vmul.f32 %v950_v14, %v232_v3  ;;  %v243_v34 = vld [vmem:[%s936_s15 + $0x120] sm:$0xff]  ;;  %v244_v35 = vld [vmem:[%s936_s15 + $0x128] sm:$0xff] }
  0x4d   : > { %389 = vst [vmem:[%s986_s18 + $0x60] sm:$0xff] %v325_v48  ;;  %390 = vst [vmem:[%s986_s18 + $0x68] sm:$0xff] %v326_v49  ;;  %v339_v10 = vmul.f32 %v953_v16, %v233_v7  ;;  %v340_v11 = vmul.f32 %v956_v18, %v234_v8  ;;  %v341_v12 = vmul.f32 %v959_v20, %v235_v9  ;;  %v245_v39 = vld [vmem:[%s936_s15 + $0x130] sm:$0xff]  ;;  %v246_v40 = vld [vmem:[%s936_s15 + $0x138] sm:$0xff] }
  0x4e   : > { %391 = vst [vmem:[%s986_s18 + $0x70] sm:$0xff] %v327_v50  ;;  %392 = vst [vmem:[%s986_s18 + $0x78] sm:$0xff] %v328_v51  ;;  %v342_v21 = vmul.f32 %v962_v22, %v236_v15  ;;  %v343_v23 = vmul.f32 %v965_v24, %v237_v17  ;;  %v344_v25 = vmul.f32 %v968_v26, %v238_v19  ;;  %v247_v41 = vld [vmem:[%s936_s15 + $0x140] sm:$0xff]  ;;  %v248_v45 = vld [vmem:[%s936_s15 + $0x148] sm:$0xff] }
  0x4f   : > { %393 = vst [vmem:[%s986_s18 + $0x80] sm:$0xff] %v329_v55  ;;  %394 = vst [vmem:[%s986_s18 + $0x88] sm:$0xff] %v330_v56  ;;  %v345_v30 = vmul.f32 %v948_v13, %v239_v27  ;;  %v346_v31 = vmul.f32 %v950_v14, %v240_v28  ;;  %v347_v32 = vmul.f32 %v953_v16, %v241_v29  ;;  %v249_v46 = vld [vmem:[%s936_s15 + $0x150] sm:$0xff]  ;;  %v250_v47 = vld [vmem:[%s936_s15 + $0x158] sm:$0xff] }
  0x50   : > { %395 = vst [vmem:[%s986_s18 + $0x90] sm:$0xff] %v331_v57  ;;  %396 = vst [vmem:[%s986_s18 + $0x98] sm:$0xff] %v332_v58  ;;  %v348_v36 = vmul.f32 %v956_v18, %v242_v33  ;;  %v349_v37 = vmul.f32 %v959_v20, %v243_v34  ;;  %v350_v38 = vmul.f32 %v962_v22, %v244_v35  ;;  %v251_v51 = vld [vmem:[%s936_s15 + $0x160] sm:$0xff]  ;;  %v252_v52 = vld [vmem:[%s936_s15 + $0x168] sm:$0xff] }
  0x51   : > { %397 = vst [vmem:[%s986_s18 + $0xa0] sm:$0xff] %v333_v62  ;;  %398 = vst [vmem:[%s986_s18 + $0xa8] sm:$0xff] %v334_v63  ;;  %v351_v42 = vmul.f32 %v965_v24, %v245_v39  ;;  %v352_v43 = vmul.f32 %v968_v26, %v246_v40  ;;  %v353_v44 = vmul.f32 %v948_v13, %v247_v41  ;;  %v253_v53 = vld [vmem:[%s936_s15 + $0x170] sm:$0xff]  ;;  %v254_v57 = vld [vmem:[%s936_s15 + $0x178] sm:$0xff] }
  0x52   : > { %399 = vst [vmem:[%s986_s18 + $0xb0] sm:$0xff] %v335_v0  ;;  %400 = vst [vmem:[%s986_s18 + $0xb8] sm:$0xff] %v336_v4  ;;  %v354_v48 = vmul.f32 %v950_v14, %v248_v45  ;;  %v355_v49 = vmul.f32 %v953_v16, %v249_v46  ;;  %v356_v50 = vmul.f32 %v956_v18, %v250_v47  ;;  %v255_v58 = vld [vmem:[%s936_s15 + $0x180] sm:$0xff]  ;;  %v256_v59 = vld [vmem:[%s936_s15 + $0x188] sm:$0xff] }
  0x53   : > { %401 = vst [vmem:[%s986_s18 + $0xc0] sm:$0xff] %v337_v5  ;;  %402 = vst [vmem:[%s986_s18 + $0xc8] sm:$0xff] %v338_v6  ;;  %v357_v54 = vmul.f32 %v959_v20, %v251_v51  ;;  %v358_v55 = vmul.f32 %v962_v22, %v252_v52  ;;  %v359_v56 = vmul.f32 %v965_v24, %v253_v53  ;;  %v257_v63 = vld [vmem:[%s936_s15 + $0x190] sm:$0xff]  ;;  %v258_v0 = vld [vmem:[%s936_s15 + $0x198] sm:$0xff] }
  0x54   : > { %403 = vst [vmem:[%s986_s18 + $0xd0] sm:$0xff] %v339_v10  ;;  %404 = vst [vmem:[%s986_s18 + $0xd8] sm:$0xff] %v340_v11  ;;  %v360_v60 = vmul.f32 %v968_v26, %v254_v57  ;;  %v361_v61 = vmul.f32 %v948_v13, %v255_v58  ;;  %v362_v62 = vmul.f32 %v950_v14, %v256_v59  ;;  %v259_v1 = vld [vmem:[%s936_s15 + $0x1a0] sm:$0xff]  ;;  %v260_v5 = vld [vmem:[%s936_s15 + $0x1a8] sm:$0xff] }
  0x55   : > { %405 = vst [vmem:[%s986_s18 + $0xe0] sm:$0xff] %v341_v12  ;;  %406 = vst [vmem:[%s986_s18 + $0xe8] sm:$0xff] %v342_v21  ;;  %v363_v2 = vmul.f32 %v953_v16, %v257_v63  ;;  %v364_v3 = vmul.f32 %v956_v18, %v258_v0  ;;  %v365_v4 = vmul.f32 %v959_v20, %v259_v1  ;;  %v261_v6 = vld [vmem:[%s936_s15 + $0x1b0] sm:$0xff]  ;;  %v262_v7 = vld [vmem:[%s936_s15 + $0x1b8] sm:$0xff] }
  0x56   : > { %407 = vst [vmem:[%s986_s18 + $0xf0] sm:$0xff] %v343_v23  ;;  %408 = vst [vmem:[%s986_s18 + $0xf8] sm:$0xff] %v344_v25  ;;  %v366_v8 = vmul.f32 %v962_v22, %v260_v5  ;;  %v367_v9 = vmul.f32 %v965_v24, %v261_v6  ;;  %v368_v10 = vmul.f32 %v968_v26, %v262_v7  ;;  %v263_v11 = vld [vmem:[%s936_s15 + $0x1c0] sm:$0xff]  ;;  %v264_v12 = vld [vmem:[%s936_s15 + $0x1c8] sm:$0xff] }
  0x57   : > { %409 = vst [vmem:[%s986_s18 + $0x100] sm:$0xff] %v345_v30  ;;  %410 = vst [vmem:[%s986_s18 + $0x108] sm:$0xff] %v346_v31  ;;  %v265_v15 = vld [vmem:[%s936_s15 + $0x1d0] sm:$0xff]  ;;  %v369_v17 = vmul.f32 %v948_v13, %v263_v11  ;;  %v370_v19 = vmul.f32 %v950_v14, %v264_v12  ;;  %v266_v23 = vld [vmem:[%s936_s15 + $0x1d8] sm:$0xff] }
  0x58   : > { %411 = vst [vmem:[%s986_s18 + $0x110] sm:$0xff] %v347_v32  ;;  %412 = vst [vmem:[%s986_s18 + $0x118] sm:$0xff] %v348_v36  ;;  %v371_v21 = vmul.f32 %v953_v16, %v265_v15  ;;  %v267_v25 = vld [vmem:[%s936_s15 + $0x1e0] sm:$0xff]  ;;  %v268_v27 = vld [vmem:[%s936_s15 + $0x1e8] sm:$0xff]  ;;  %v372_v28 = vmul.f32 %v956_v18, %v266_v23 }
  0x59   : > { %413 = vst [vmem:[%s986_s18 + $0x120] sm:$0xff] %v349_v37  ;;  %414 = vst [vmem:[%s986_s18 + $0x128] sm:$0xff] %v350_v38  ;;  %v373_v13 = vmul.f32 %v959_v20, %v267_v25  ;;  %v374_v14 = vmul.f32 %v962_v22, %v268_v27  ;;  %v269_v16 = vld [vmem:[%s936_s15 + $0x1f0] sm:$0xff]  ;;  %v270_v29 = vld [vmem:[%s936_s15 + $0x1f8] sm:$0xff] }
  0x5a   : > { %415 = vst [vmem:[%s986_s18 + $0x130] sm:$0xff] %v351_v42  ;;  %416 = vst [vmem:[%s986_s18 + $0x138] sm:$0xff] %v352_v43  ;;  %v375_v18 = vmul.f32 %v965_v24, %v269_v16  ;;  %v376_v20 = vmul.f32 %v968_v26, %v270_v29 }
  0x5b   : > { %417 = vst [vmem:[%s986_s18 + $0x140] sm:$0xff] %v353_v44  ;;  %418 = vst [vmem:[%s986_s18 + $0x148] sm:$0xff] %v354_v48 }
  0x5c   : > { %419 = vst [vmem:[%s986_s18 + $0x150] sm:$0xff] %v355_v49  ;;  %420 = vst [vmem:[%s986_s18 + $0x158] sm:$0xff] %v356_v50 }
  0x5d   : > { %421 = vst [vmem:[%s986_s18 + $0x160] sm:$0xff] %v357_v54  ;;  %422 = vst [vmem:[%s986_s18 + $0x168] sm:$0xff] %v358_v55 }
  0x5e   : > { %423 = vst [vmem:[%s986_s18 + $0x170] sm:$0xff] %v359_v56  ;;  %424 = vst [vmem:[%s986_s18 + $0x178] sm:$0xff] %v360_v60 }
  0x5f   : > { %425 = vst [vmem:[%s986_s18 + $0x180] sm:$0xff] %v361_v61  ;;  %426 = vst [vmem:[%s986_s18 + $0x188] sm:$0xff] %v362_v62 }
  0x60   : > { %427 = vst [vmem:[%s986_s18 + $0x190] sm:$0xff] %v363_v2  ;;  %428 = vst [vmem:[%s986_s18 + $0x198] sm:$0xff] %v364_v3 }
  0x61   : > { %429 = vst [vmem:[%s986_s18 + $0x1a0] sm:$0xff] %v365_v4  ;;  %430 = vst [vmem:[%s986_s18 + $0x1a8] sm:$0xff] %v366_v8 }
  0x62   : > { %431 = vst [vmem:[%s986_s18 + $0x1b0] sm:$0xff] %v367_v9  ;;  %432 = vst [vmem:[%s986_s18 + $0x1b8] sm:$0xff] %v368_v10 }
  0x63   : > { %433 = vst [vmem:[%s986_s18 + $0x1c0] sm:$0xff] %v369_v17  ;;  %434 = vst [vmem:[%s986_s18 + $0x1c8] sm:$0xff] %v370_v19 }
  0x64   : > { %435 = vst [vmem:[%s986_s18 + $0x1d0] sm:$0xff] %v371_v21  ;;  %436 = vst [vmem:[%s986_s18 + $0x1d8] sm:$0xff] %v372_v28 }
  0x65   : > { %437 = vst [vmem:[%s986_s18 + $0x1e0] sm:$0xff] %v373_v13  ;;  %438 = vst [vmem:[%s986_s18 + $0x1e8] sm:$0xff] %v374_v14 }
  0x66   : > { %439 = vst [vmem:[%s986_s18 + $0x1f0] sm:$0xff] %v375_v18  ;;  %440 = vst [vmem:[%s986_s18 + $0x1f8] sm:$0xff] %v376_v20 }
  0x67   : > { %724 = shalt.err (!%p721_p9)
}
  0x68   : > { %s725_s4 = scalar_lea.hbm %s1153_s16, 8192  ;;  %s729_s17 = scalar_lea.hbm %s1215_s2, 16384 }
  0x69   : > { %p726_p0 = scmp.ne.s32.totalorder %s1153_s16, %s725_s4  ;;  %p730_p10 = scmp.lt.s32.totalorder %s1153_s16, %s1215_s2 }
  0x6a   : > { %p731_p11 = scmp.lt.s32.totalorder %s729_s17, %s725_s4 }
  0x6b   : > { %p727_p2 = pnand %p726_p0, %p1227_p13 }
  0x6c   : > { %p732_p5 = por %p731_p11, %p730_p10 }
  0x6d   : > { %p728_p6 = pneg %p727_p2 }
  0x6f   : > { %p733_p3 = pnand %p732_p5, %p728_p6 }
  0x71   : > { %736 = shalt.err (!%p733_p3)
}
  0x72   : > { %s802_s15 = smov 1024   ;;  %s803_s18 = smov 64  }
  0x73   : > { %586 = dma.vmem_to_hbm [thread:$0]  (%p1227_p13), %s1155_s23, 8192, %s1153_s16, %s442_s19, %s802_s15, %s802_s15, %s803_s18  }
  0x74 PF: > { %s473_s20 = sand.u32 1, %s775_s9   ;;  %p1228_p4 = scmp.ne.s32.totalorder %s1222_s22, 0 }
  0x75   : > { %p1229_p1 = scmp.ge.s32.totalorder %s795_s14, 2  ;;  %s474_s12 = scalar_lea.sflag [#allocation4], %s473_s20 }
  0x77   : > { %p597_p12 = pnand %p1229_p1, %p1228_p4 }
  0x79   : > { %p598_p7 = pneg %p597_p12 }
  0x7b   : > { %770 = dma.done.wait (%p598_p7), %s474_s12, 8192  }
  0x7c   : > { %772 = vsyncadd (%p598_p7), %s474_s12, 4294959104  ;;  %s19_s14 = sadd.s32 1, %s795_s14   ;;  %s1230_s9 = smov %s779_s10 }
  0x7d   : > { %p16_p8 = scmp.ge.s32.totalorder %s19_s14, 4   ;;  %s1231_s10 = smov %s783_s11 }
  0x7e   : > { %s1232_s11 = smov %s921_s27  ;;  %s1233_s12 = smov %s791_s13 }
  0x7f   : > { %s1234_s13 = smov %s1236_s28  ;;  %18 = sbr.rel (!%p16_p8) target bundleno = 7 (0x7), region = 78 }
  0x84   :  { %479 = vsyncpa [#allocation3], 1 }
  0x85   :  { %481 = vsyncpa [#allocation3 + $0x1], 1 }
  0x86   :  { %482 = vsyncpa [#allocation6], 1 }
  0x87   :  { %483 = vsyncpa [#allocation4], 1 }
  0x88   :  { %485 = vsyncpa [#allocation4 + $0x1], 1 }

</bundles_post_ra>
